<compile_context>
chip_gen: v7x
topology: tpu7x:2x2x1
jax: 0.10.0
libtpu: 0.0.40
codegen_flags: <defaults>
</compile_context>

<pallas_src>
import functools

import jax
import jax.numpy as jnp
from jax.experimental import pallas as pl
from jax.experimental.pallas import tpu as pltpu


def _dice_partial_kernel(logit_ref, tgt_ref, inter_ref, union_ref,
                         inter_sc, union_sc, *, activation, hw):
    m = pl.program_id(1)

    @pl.when(m == 0)
    def _():
        inter_sc[...] = jnp.zeros_like(inter_sc)
        union_sc[...] = jnp.zeros_like(union_sc)

    x = logit_ref[0]                                   # (C, tm), native dtype
    if activation == "sigmoid":
        p = jax.nn.sigmoid(x).astype(jnp.float32)
    else:  # softmax over the class dim (dim=1 in NCHW == axis 0 here)
        p = jax.nn.softmax(x.astype(jnp.float32), axis=0)

    c, tm = p.shape
    tgt = tgt_ref[0]                                   # (1, tm) int32
    class_ids = jax.lax.broadcasted_iota(jnp.int32, (c, tm), 0)
    onehot = (tgt == class_ids).astype(jnp.float32)    # on-the-fly one-hot

    inter_term = p * onehot
    union_term = p + onehot
    if hw % tm != 0:
        # Mask out-of-range lanes of the (padded) edge tile. Use a select, not
        # a multiply, so garbage padding (possibly NaN) cannot leak in.
        lane = jax.lax.broadcasted_iota(jnp.int32, (c, tm), 1)
        valid = (m * tm + lane) < hw
        inter_term = jnp.where(valid, inter_term, 0.0)
        union_term = jnp.where(valid, union_term, 0.0)

    # Wide accumulators: pure VPU elementwise adds in the steady state; the
    # cross-lane (XLU) reduce is deferred to the epilogue below.
    inter_sc[...] += inter_term
    union_sc[...] += union_term

    @pl.when(m == pl.num_programs(1) - 1)
    def _():
        inter_ref[0] = jnp.sum(inter_sc[...], axis=1, keepdims=True)  # (C, 1)
        union_ref[0] = jnp.sum(union_sc[...], axis=1, keepdims=True)  # (C, 1)


def dice_loss(logits, targets, class_weights, *,
              smooth=1e-8, activation="sigmoid", tm=8192):
    """logits: (N, C, H, W) float; targets: (N, H, W) int with values in [0, C)."""
    N, C, H, W = logits.shape
    HW = H * W

    # Free reshapes only -- no transpose / no extra HBM pass over the inputs.
    logits_nchw = logits.reshape(N, C, HW)
    tgt_n1hw = targets.reshape(N, 1, HW).astype(jnp.int32)

    if HW <= tm:
        tm_eff = HW            # one tile spans the whole row (any size is OK)
    else:
        assert tm % 128 == 0, "tm must be a multiple of the 128-lane width"
        tm_eff = tm
    num_m = pl.cdiv(HW, tm_eff)

    kernel = functools.partial(_dice_partial_kernel, activation=activation, hw=HW)

    inter_nc1, union_nc1 = pl.pallas_call(
        kernel,
        out_shape=(jax.ShapeDtypeStruct((N, C, 1), jnp.float32),
                   jax.ShapeDtypeStruct((N, C, 1), jnp.float32)),
        grid_spec=pltpu.PrefetchScalarGridSpec(
            num_scalar_prefetch=0,
            grid=(N, num_m),
            in_specs=[
                pl.BlockSpec((1, C, tm_eff), lambda n, m: (n, 0, m)),  # logits
                pl.BlockSpec((1, 1, tm_eff), lambda n, m: (n, 0, m)),  # targets
            ],
            out_specs=[
                pl.BlockSpec((1, C, 1), lambda n, m: (n, 0, 0)),
                pl.BlockSpec((1, C, 1), lambda n, m: (n, 0, 0)),
            ],
            scratch_shapes=[pltpu.VMEM((C, tm_eff), jnp.float32)] * 2,
        ),
        compiler_params=pltpu.CompilerParams(
            dimension_semantics=("parallel", "arbitrary")),
    )(logits_nchw, tgt_n1hw)

    # Tiny O(C) epilogue in plain JAX (also merges per-batch / per-core partials).
    inter = jnp.sum(inter_nc1, axis=(0, 2))
    union = jnp.sum(union_nc1, axis=(0, 2))
    dice = (2.0 * inter + smooth) / (union + smooth)
    return jnp.dot(1.0 - dice, class_weights.astype(jnp.float32))


def dice_loss_ref(logits, targets, class_weights, *, smooth=1e-8, activation="sigmoid"):
    """Pure-JAX reference matching the PyTorch forward."""
    N, C, H, W = logits.shape
    x = logits.astype(jnp.float32)
    if activation == "sigmoid":
        p = jax.nn.sigmoid(x)
    else:
        p = jax.nn.softmax(x, axis=1)
    onehot = jax.nn.one_hot(targets, C, dtype=jnp.float32).transpose(0, 3, 1, 2)
    dims = (0, 2, 3)
    inter = jnp.sum(p * onehot, axis=dims)
    union = jnp.sum(p, axis=dims) + jnp.sum(onehot, axis=dims)
    dice = (2.0 * inter + smooth) / (union + smooth)
    return jnp.dot(1.0 - dice, class_weights.astype(jnp.float32))


if __name__ == "__main__":
    # Module config (deterministic, in-script): num_classes=4, sigmoid activation.
    N, C, H, W = 2, 4, 16, 16
    smooth = 1e-8
    class_weights = jnp.array([0.5, 1.0, 1.5, 2.0], dtype=jnp.float32)

    key = jax.random.PRNGKey(0)
    k_logits, k_tgt, k_logits2, k_tgt2 = jax.random.split(key, 4)
    logits = jax.random.normal(k_logits, (N, C, H, W), dtype=jnp.float32)
    targets = jax.random.randint(k_tgt, (N, H, W), 0, C, dtype=jnp.int32)

    # 1) sigmoid activation (module default).
    loss = jax.block_until_ready(
        dice_loss(logits, targets, class_weights, smooth=smooth, activation="sigmoid"))
    ref = dice_loss_ref(logits, targets, class_weights, smooth=smooth, activation="sigmoid")
    assert jnp.allclose(loss, ref, rtol=1e-5, atol=1e-5), (loss, ref)

    # 2) softmax activation path.
    loss_sm = jax.block_until_ready(
        dice_loss(logits, targets, class_weights, smooth=smooth, activation="softmax"))
    ref_sm = dice_loss_ref(logits, targets, class_weights, smooth=smooth, activation="softmax")
    assert jnp.allclose(loss_sm, ref_sm, rtol=1e-5, atol=1e-5), (loss_sm, ref_sm)

    # 3) remainder-tile (masked) path: HW=400 is not a multiple of tm=128.
    H2 = W2 = 20
    logits2 = jax.random.normal(k_logits2, (N, C, H2, W2), dtype=jnp.float32)
    targets2 = jax.random.randint(k_tgt2, (N, H2, W2), 0, C, dtype=jnp.int32)
    loss2 = jax.block_until_ready(
        dice_loss(logits2, targets2, class_weights, smooth=smooth,
                  activation="sigmoid", tm=128))
    ref2 = dice_loss_ref(logits2, targets2, class_weights, smooth=smooth,
                         activation="sigmoid")
    assert jnp.allclose(loss2, ref2, rtol=1e-5, atol=1e-5), (loss2, ref2)

    print("KERNEL_OK")
</pallas_src>

<mosaic_0001>
module attributes {stable_mosaic.version = 11 : i64} {
  func.func @_dice_partial_kernel(%arg0: i32, %arg1: i32, %arg2: memref<1x4x256xf32, #tpu.memory_space<vmem>>, %arg3: memref<1x1x256xi32, #tpu.memory_space<vmem>>, %arg4: memref<1x4x1xf32, #tpu.memory_space<vmem>>, %arg5: memref<1x4x1xf32, #tpu.memory_space<vmem>>, %arg6: memref<4x256xf32, #tpu.memory_space<vmem>>, %arg7: memref<4x256xf32, #tpu.memory_space<vmem>>) attributes {dimension_semantics = [#tpu.dimension_semantics<parallel>, #tpu.dimension_semantics<arbitrary>], iteration_bounds = array<i64: 2, 1>, scalar_prefetch = 0 : i64, scratch_operands = 2 : i64, tpu.core_type = #tpu.core_type<tc>, window_params = [{transform_indices = @transform_0, window_bounds = array<i64: 1, 4, 256>}, {transform_indices = @transform_1, window_bounds = array<i64: 1, 1, 256>}, {transform_indices = @transform_2, window_bounds = array<i64: 1, 4, 1>}, {transform_indices = @transform_3, window_bounds = array<i64: 1, 4, 1>}]} {
    %c0_i32 = arith.constant 0 : i32
    %0 = arith.cmpi eq, %arg1, %c0_i32 : i32
    %1 = arith.extui %0 : i1 to i32
    %c0_i32_0 = arith.constant 0 : i32
    %2 = arith.cmpi ne, %1, %c0_i32_0 : i32
    scf.if %2 {
      %cst_16 = arith.constant 0.000000e+00 : f32
      %28 = vector.broadcast %cst_16 : f32 to vector<4x256xf32>
      %c0_17 = arith.constant 0 : index
      %c0_18 = arith.constant 0 : index
      %29 = vector.load %arg6[%c0_17, %c0_18] : memref<4x256xf32, #tpu.memory_space<vmem>>, vector<4x256xf32>
      tpu.vector_store %arg6[%c0_17, %c0_18], %28 {strides = array<i32>} : memref<4x256xf32, #tpu.memory_space<vmem>>, vector<4x256xf32>,
      %cst_19 = arith.constant 0.000000e+00 : f32
      %30 = vector.broadcast %cst_19 : f32 to vector<4x256xf32>
      %c0_20 = arith.constant 0 : index
      %c0_21 = arith.constant 0 : index
      %31 = vector.load %arg7[%c0_20, %c0_21] : memref<4x256xf32, #tpu.memory_space<vmem>>, vector<4x256xf32>
      tpu.vector_store %arg7[%c0_20, %c0_21], %30 {strides = array<i32>} : memref<4x256xf32, #tpu.memory_space<vmem>>, vector<4x256xf32>,
    } else {
    }
    %c0 = arith.constant 0 : index
    %c0_1 = arith.constant 0 : index
    %c0_2 = arith.constant 0 : index
    %3 = vector.load %arg2[%c0, %c0_1, %c0_2] : memref<1x4x256xf32, #tpu.memory_space<vmem>>, vector<1x4x256xf32>
    %4 = vector.shape_cast %3 : vector<1x4x256xf32> to vector<4x256xf32>
    %5 = arith.negf %4 : vector<4x256xf32>
    %6 = math.exp %5 : vector<4x256xf32>
    %cst = arith.constant 1.000000e+00 : f32
    %7 = vector.broadcast %cst : f32 to vector<4x256xf32>
    %8 = arith.addf %7, %6 : vector<4x256xf32>
    %9 = arith.divf %7, %8 : vector<4x256xf32>
    %c0_3 = arith.constant 0 : index
    %c0_4 = arith.constant 0 : index
    %c0_5 = arith.constant 0 : index
    %10 = vector.load %arg3[%c0_3, %c0_4, %c0_5] : memref<1x1x256xi32, #tpu.memory_space<vmem>>, vector<1x1x256xi32>
    %11 = vector.shape_cast %10 : vector<1x1x256xi32> to vector<1x256xi32>
    %12 = tpu.iota {dimensions = array<i32: 0>} : vector<4x256xi32>
    %13 = vector.broadcast %11 : vector<1x256xi32> to vector<4x256xi32>
    %14 = arith.cmpi eq, %13, %12 : vector<4x256xi32>
    %15 = arith.extui %14 : vector<4x256xi1> to vector<4x256xi32>
    %16 = arith.sitofp %15 : vector<4x256xi32> to vector<4x256xf32>
    %17 = arith.mulf %9, %16 : vector<4x256xf32>
    %18 = arith.addf %9, %16 : vector<4x256xf32>
    %c0_6 = arith.constant 0 : index
    %c0_7 = arith.constant 0 : index
    %19 = vector.load %arg6[%c0_6, %c0_7] : memref<4x256xf32, #tpu.memory_space<vmem>>, vector<4x256xf32>
    %20 = arith.addf %19, %17 : vector<4x256xf32>
    %c0_8 = arith.constant 0 : index
    %c0_9 = arith.constant 0 : index
    %21 = vector.load %arg6[%c0_8, %c0_9] : memref<4x256xf32, #tpu.memory_space<vmem>>, vector<4x256xf32>
    tpu.vector_store %arg6[%c0_8, %c0_9], %20 {strides = array<i32>} : memref<4x256xf32, #tpu.memory_space<vmem>>, vector<4x256xf32>,
    %c0_10 = arith.constant 0 : index
    %c0_11 = arith.constant 0 : index
    %22 = vector.load %arg7[%c0_10, %c0_11] : memref<4x256xf32, #tpu.memory_space<vmem>>, vector<4x256xf32>
    %23 = arith.addf %22, %18 : vector<4x256xf32>
    %c0_12 = arith.constant 0 : index
    %c0_13 = arith.constant 0 : index
    %24 = vector.load %arg7[%c0_12, %c0_13] : memref<4x256xf32, #tpu.memory_space<vmem>>, vector<4x256xf32>
    tpu.vector_store %arg7[%c0_12, %c0_13], %23 {strides = array<i32>} : memref<4x256xf32, #tpu.memory_space<vmem>>, vector<4x256xf32>,
    %c0_i32_14 = arith.constant 0 : i32
    %25 = arith.cmpi eq, %arg1, %c0_i32_14 : i32
    %26 = arith.extui %25 : i1 to i32
    %c0_i32_15 = arith.constant 0 : i32
    %27 = arith.cmpi ne, %26, %c0_i32_15 : i32
    scf.if %27 {
      %c0_16 = arith.constant 0 : index
      %c0_17 = arith.constant 0 : index
      %28 = vector.load %arg6[%c0_16, %c0_17] : memref<4x256xf32, #tpu.memory_space<vmem>>, vector<4x256xf32>
      %cst_18 = arith.constant dense<0.000000e+00> : vector<4xf32>
      %29 = vector.multi_reduction <add>, %28, %cst_18 [1] : vector<4x256xf32> to vector<4xf32>
      %30 = vector.shape_cast %29 : vector<4xf32> to vector<4x1xf32>
      %c0_19 = arith.constant 0 : index
      %c0_20 = arith.constant 0 : index
      %c0_21 = arith.constant 0 : index
      %31 = vector.load %arg4[%c0_19, %c0_20, %c0_21] : memref<1x4x1xf32, #tpu.memory_space<vmem>>, vector<1x4x1xf32>
      %32 = vector.shape_cast %31 : vector<1x4x1xf32> to vector<4x1xf32>
      %33 = vector.shape_cast %30 : vector<4x1xf32> to vector<1x4x1xf32>
      tpu.vector_store %arg4[%c0_19, %c0_20, %c0_21], %33 {strides = array<i32>} : memref<1x4x1xf32, #tpu.memory_space<vmem>>, vector<1x4x1xf32>,
      %c0_22 = arith.constant 0 : index
      %c0_23 = arith.constant 0 : index
      %34 = vector.load %arg7[%c0_22, %c0_23] : memref<4x256xf32, #tpu.memory_space<vmem>>, vector<4x256xf32>
      %cst_24 = arith.constant dense<0.000000e+00> : vector<4xf32>
      %35 = vector.multi_reduction <add>, %34, %cst_24 [1] : vector<4x256xf32> to vector<4xf32>
      %36 = vector.shape_cast %35 : vector<4xf32> to vector<4x1xf32>
      %c0_25 = arith.constant 0 : index
      %c0_26 = arith.constant 0 : index
      %c0_27 = arith.constant 0 : index
      %37 = vector.load %arg5[%c0_25, %c0_26, %c0_27] : memref<1x4x1xf32, #tpu.memory_space<vmem>>, vector<1x4x1xf32>
      %38 = vector.shape_cast %37 : vector<1x4x1xf32> to vector<4x1xf32>
      %39 = vector.shape_cast %36 : vector<4x1xf32> to vector<1x4x1xf32>
      tpu.vector_store %arg5[%c0_25, %c0_26, %c0_27], %39 {strides = array<i32>} : memref<1x4x1xf32, #tpu.memory_space<vmem>>, vector<1x4x1xf32>,
    } else {
    }
    return
  }
  func.func @transform_0(%arg0: i32, %arg1: i32) -> (i32, i32, i32) {
    %c0_i32 = arith.constant 0 : i32
    %c0_i32_0 = arith.constant 0 : i32
    return %arg0, %c0_i32, %arg1 : i32, i32, i32
  }
  func.func @transform_1(%arg0: i32, %arg1: i32) -> (i32, i32, i32) {
    %c0_i32 = arith.constant 0 : i32
    %c0_i32_0 = arith.constant 0 : i32
    return %arg0, %c0_i32, %arg1 : i32, i32, i32
  }
  func.func @transform_2(%arg0: i32, %arg1: i32) -> (i32, i32, i32) {
    %c0_i32 = arith.constant 0 : i32
    %c0_i32_0 = arith.constant 0 : i32
    %c0_i32_1 = arith.constant 0 : i32
    return %arg0, %c0_i32, %c0_i32_0 : i32, i32, i32
  }
  func.func @transform_3(%arg0: i32, %arg1: i32) -> (i32, i32, i32) {
    %c0_i32 = arith.constant 0 : i32
    %c0_i32_0 = arith.constant 0 : i32
    %c0_i32_1 = arith.constant 0 : i32
    return %arg0, %c0_i32, %c0_i32_0 : i32, i32, i32
  }
}

</mosaic_0001>

<bundles_post_ra>
// kernel: tpu_custom_call.1
= control target key start
LH: loop header
LB: loop body
LE: loop exit
PB: predicated region body
PF: predicated region fallthrough
CT: control target
= control target key end

     0   :  { %9 = vsyncpa [#allocation5], 0  ;;  %s853_s0 = inlined_call_operand.hbm [shape: f32[2,4,256], index: 0, kind: input, shape index: {}]   ;;  %s854_s1 = inlined_call_operand.hbm [shape: s32[2,1,256], index: 1, kind: input, shape index: {}]   ;;  %s855_s2 = inlined_call_operand.vmem [shape: f32[2,4,1], index: 2, kind: output, shape index: {0}]   ;;  %s856_s3 = inlined_call_operand.vmem [shape: f32[2,4,1], index: 3, kind: output, shape index: {1}]  }
   0x1   :  { %11 = vsyncpa [#allocation5 + $0x1], 0 }
   0x2   :  { %12 = vsyncpa [#allocation7], 0 }
   0x3   :  { %14 = vsyncpa [#allocation7 + $0x1], 0  ;;  %s684_s12 = smov 0   ;;  %s686_s13 = smov 0  }
   0x4   :  { %s688_s14 = smov 0   ;;  %s690_s15 = smov 0  }
   0x5   :  { %s692_s16 = smov 0   ;;  %s694_s17 = smov 0  }
   0x6 LB: > { %s458_s18 = sadd.s32 4294967295, %s659_s17   ;;  %s32_s19 = sadd.s32 1, %s655_s16  ;;  %s659_s17 = sphi %s694_s17, %s20_s17   ;;  %s655_s16 = sphi %s692_s16, %s870_s16   ;;  %s651_s15 = sphi %s690_s15, %s869_s15   ;;  %s647_s14 = sphi %s688_s14, %s868_s14   ;;  %s643_s13 = sphi %s686_s13, %s867_s13   ;;  %s639_s12 = sphi %s684_s12, %s866_s12  }
   0x7   : > { %p34_p0 = scmp.ge.s32.totalorder %s32_s19, 2  ;;  %s41_s20 = sadd.s32 1, %s647_s14 }
   0x8   : > { %p48_p1 = scmp.ne.s32.totalorder %s647_s14, %s643_s13  ;;  %p49_p2 = scmp.eq.s32.totalorder %s659_s17, 0 }
   0x9   : > { %s872_s19 = smov (%p34_p0, %s32_s19), 0  ;;  %p54_p4 = scmp.ne.s32.totalorder %s643_s13, %s639_s12 }
   0xa   : > { %p720_p3 = por %p49_p2, %p48_p1  ;;  %s36_s22 = ssub.s32 %s655_s16, %s872_s19 }
   0xb   : > { %p55_p5 = scmp.eq.s32.totalorder %s458_s18, 0  ;;  %p39_p6 = scmp.eq.s32.totalorder %s36_s22, 0 }
   0xc   : > { %p491_p8 = scmp.lt.s32.totalorder %s659_s17, 2  ;;  %s736_s25 = sand.u32 1, %s647_s14  }
   0xd   : > { %p727_p7 = por %p55_p5, %p54_p4  ;;  %s478_s26 = sshll.u32 %s655_s16, 7 }
   0xe   : > { %s733_s24 = scalar_select %p39_p6, %s647_s14, %s41_s20  }
   0xf   : > { %s859_s23 = scalar_select %p727_p7, 1, 0 }
  0x10   : > { %s462_s27 = sshll.u32 %s736_s25, 3  ;;  %s743_s30 = scalar_lea.hbm %s853_s0, %s478_s26 }
  0x11   : > { %s162_s4 = scalar_lea.vmem [#allocation4], %s462_s27  ;;  %p747_p9 = pnand %p491_p8, %p720_p3 }
  0x12   : > { %s172_s5 = sshll.u32 %s162_s4, 4  ;;  %s159_s7 = scalar_lea.sflag [#allocation5], %s736_s25  ;;  %s751_s5 = int_to_ptr.vmem [resolvable:$true] %s172_s5 }
  0x13   : > { %s545_s8 = scalar_lea.hbm %s743_s30, 128  ;;  %p547_p13 = pneg %p747_p9 }
  0x14   : > { %p546_p12 = scmp.ne.s32.totalorder %s743_s30, %s545_s8  ;;  %s550_s11 = scalar_lea.hbm %s853_s0, 256 }
  0x15   : > { %p551_p2 = scmp.lt.u32.totalorder %s743_s30, %s853_s0  ;;  %p552_p3 = scmp.lt.u32.totalorder %s550_s11, %s545_s8 }
  0x16   : > { %p548_p0 = pnand %p547_p13, %p546_p12  ;;  %p554_p5 = scmp.lt.u32.totalorder %s545_s8, %s743_s30 }
  0x17   : > { %p553_p4 = por %p552_p3, %p551_p2 }
  0x18   : > { %p549_p1 = pneg %p548_p0 }
  0x19   : > { %p555_p6 = por %p554_p5, %p553_p4 }
  0x1b   : > { %p556_p8 = pnand %p555_p6, %p549_p1 }
  0x1d   : > { %559 = shalt.err (!%p556_p8)
}
  0x1e   : > { %s560_s20 = scalar_lea.vmem %s751_s5, 128  ;;  %s661_s21 = smov [#allocation4]  }
  0x1f   : > { %p561_p12 = scmp.ne.s32.totalorder %s751_s5, %s560_s20  ;;  %s565_s22 = sshll.u32 %s661_s21, 4  ;;  %s566_s22 = int_to_ptr.vmem [resolvable:$false] %s565_s22 }
  0x20   : > { %s567_s26 = scalar_lea.vmem %s566_s22, 256  ;;  %p568_p11 = scmp.lt.s32.totalorder %s751_s5, %s566_s22 }
  0x21   : > { %p563_p0 = pnand %p561_p12, %p547_p13  ;;  %p569_p2 = scmp.lt.s32.totalorder %s567_s26, %s560_s20 }
  0x23   : > { %p564_p10 = pneg %p563_p0  ;;  %p570_p3 = por %p569_p2, %p568_p11 }
  0x25   : > { %p571_p4 = pnand %p570_p3, %p564_p10 }
  0x27   : > { %574 = shalt.err (!%p571_p4)
}
  0x28   : > { %487 = dma.hbm_to_vmem [thread:$0]  (!%p747_p9), %s743_s30, 128, %s751_s5, %s159_s7  }
  0x29   : > { %p861_p1 = scmp.lt.s32.totalorder %s659_s17, 3  ;;  %p862_p5 = scmp.ge.s32.totalorder %s659_s17, 1 }
  0x2a   : > { %s465_s28 = sshll.u32 %s736_s25, 1  ;;  %s479_s29 = sshll.u32 %s655_s16, 5 }
  0x2b   : > { %p785_p6 = pnand %p862_p5, %p861_p1  ;;  %s794_s9 = scalar_lea.hbm %s854_s1, %s479_s29 }
  0x2c   : > { %s183_s10 = scalar_lea.vmem [#allocation6], %s465_s28  ;;  %s180_s30 = scalar_lea.sflag [#allocation7], %s736_s25 }
  0x2d   : > { %s863_s27 = scalar_select %p785_p6, 1, 0 }
  0x2e   : > { %s193_s11 = sshll.u32 %s183_s10, 4  ;;  %s575_s5 = scalar_lea.hbm %s794_s9, 32  ;;  %s194_s11 = int_to_ptr.vmem [resolvable:$true] %s193_s11 }
  0x2f   : > { %p576_p10 = scmp.ne.s32.totalorder %s794_s9, %s575_s5  ;;  %s580_s18 = scalar_lea.hbm %s854_s1, 64 }
  0x30   : > { %p581_p12 = scmp.lt.u32.totalorder %s794_s9, %s854_s1  ;;  %p582_p0 = scmp.lt.u32.totalorder %s580_s18, %s575_s5 }
  0x31   : > { %p578_p11 = pnand %p576_p10, %p547_p13  ;;  %p584_p3 = scmp.lt.u32.totalorder %s575_s5, %s794_s9 }
  0x32   : > { %p583_p2 = por %p582_p0, %p581_p12 }
  0x33   : > { %p579_p8 = pneg %p578_p11 }
  0x34   : > { %p585_p4 = por %p584_p3, %p583_p2 }
  0x36   : > { %p586_p1 = pnand %p585_p4, %p579_p8 }
  0x38   : > { %589 = shalt.err (!%p586_p1)
}
  0x39   : > { %s590_s25 = scalar_lea.vmem %s194_s11, 32  ;;  %s662_s22 = smov [#allocation6]  }
  0x3a   : > { %p591_p5 = scmp.ne.s32.totalorder %s194_s11, %s590_s25  ;;  %s595_s26 = sshll.u32 %s662_s22, 4  ;;  %s596_s26 = int_to_ptr.vmem [resolvable:$false] %s595_s26 }
  0x3b   : > { %s597_s28 = scalar_lea.vmem %s596_s26, 64  ;;  %p598_p7 = scmp.lt.s32.totalorder %s194_s11, %s596_s26 }
  0x3c   : > { %p593_p10 = pnand %p591_p5, %p547_p13  ;;  %p599_p6 = scmp.lt.s32.totalorder %s597_s28, %s590_s25 }
  0x3e   : > { %p594_p11 = pneg %p593_p10  ;;  %p600_p0 = por %p599_p6, %p598_p7 }
  0x40   : > { %p601_p12 = pnand %p600_p0, %p594_p11 }
  0x42   : > { %604 = shalt.err (!%p601_p12)
}
  0x43   : > { %490 = dma.hbm_to_vmem [thread:$0]  (!%p747_p9), %s794_s9, 32, %s194_s11, %s180_s30  }
  0x44   : > { %p864_p8 = scmp.ne.s32.totalorder %s863_s27, 0 }
  0x45   : > { %s204_s29 = sand.u32 (!%p864_p8), 1, %s643_s13   ;;  %p865_p13 = scmp.ne.s32.totalorder (!%p864_p8), %s859_s23, 0 }
  0x46   : > { %202 = sbr.rel (%p864_p8) target bundleno = 262 (0x106), region = 28  ;;  %s469_s4 = sshll.u32 (!%p864_p8), %s204_s29, 3 }
  0x47   : > { %s205_s8 = scalar_lea.sflag (!%p864_p8), [#allocation5], %s204_s29  ;;  %s208_s10 = scalar_lea.vmem (!%p864_p8), [#allocation4], %s469_s4 }
  0x4d   : > { %630 = dma.done.wait (%p865_p13), %s205_s8, 128  }
  0x4e   : > { %632 = vsyncadd (%p865_p13), %s205_s8, 4294967168  ;;  %s470_s5 = sshll.u32 %s204_s29, 1  ;;  %s214_s7 = scalar_lea.sflag [#allocation7], %s204_s29 }
  0x4f   : > { %s217_s6 = scalar_lea.vmem [#allocation6], %s470_s5 }
  0x50   : > { %634 = dma.done.wait (%p865_p13), %s214_s7, 32  }
  0x51   : > { %636 = vsyncadd (%p865_p13), %s214_s7, 4294967264  ;;  %v264_v0 = vld [vmem:[%s208_s10] sm:$0xff]  ;;  %v272_v2 = vlaneseq  ;;  %v271_v6 = vld [vmem:[%s217_s6] sm:$0x3]  ;;  %v663_v11 = vmov 0.0   ;;  %vm307_vm2 = vcmask 1043456  }
  0x52   : > { %v473_v1 = vmul.f32 -1.442695, %v264_v0  ;;  %p250_p7 = scmp.lt.s32.totalorder %s651_s15, 1  ;;  %vm313_vm3 = vcmask 3072  }
  0x53   : > { %v273_v3 = vshrl.u32 %v272_v2, 7 }
  0x54   : > { %541 = vpow2.f32 %v473_v1  ;;  %s874_s15 = smov (!%p250_p7, %s651_s15), 1 }
  0x55   : > { %v276_v4 = vsub.s32 0, %v273_v3  ;;  %v280_v5 = vsub.s32 1, %v273_v3  ;;  %s471_s23 = sshll.u32 %s874_s15, 2 }
  0x56   : > { %s253_s11 = scalar_lea.vmem %s855_s2, %s471_s23  ;;  %s257_s18 = scalar_lea.vmem %s856_s3, %s471_s23 }
  0x57   : > { %v277_v8 = vrot.slane %v271_v6, %v276_v4  ;;  %v281_v9 = vrot.slane %v271_v6, %v280_v5 }
  0x59   : > { %vm282_vm0 = vcmp.eq.s32.totalorder %v277_v8, %v273_v3  ;;  %vm283_vm1 = vcmp.eq.s32.totalorder %v281_v9, %v273_v3 }
  0x5a   : > { %v474_v12 = vsel %vm282_vm0, 1.0, %v663_v11  ;;  %v475_v13 = vsel %vm283_vm1, 1.0, %v663_v11 }
  0x5b   : > { %v290_v14 = vcombine.low %v474_v12, %v475_v13 }
  0x5e   : > { %v542_v7 = vpop.eup %541 }
  0x5f   : > { %v268_v10 = vadd.f32 1.0, %v542_v7 }
  0x61   : > { %543 = vrcp.f32 %v268_v10 }
  0x6b   : > { %v544_v15 = vpop.eup %543 }
  0x6c   : > { %v292_v16 = vmul.f32 %v544_v15, %v290_v14  ;;  %v293_v17 = vadd.f32 %v544_v15, %v290_v14 }
  0x6e   : > { %v305_v18 = vcombine.high %v292_v16, %v292_v16  ;;  %v308_v19 = vsel %vm307_vm2, %v292_v16, 0.0  ;;  %v317_v20 = vcombine.high %v293_v17, %v293_v17  ;;  %v319_v22 = vsel %vm307_vm2, %v293_v17, 0.0 }
  0x70   : > { %v309_v21 = vsel %vm307_vm2, %v305_v18, 0.0  ;;  %v320_v23 = vsel %vm307_vm2, %v317_v20, 0.0 }
  0x71   : > { %v310_v24 = vadd.f32 %v309_v21, %v308_v19  ;;  %v321_v25 = vadd.f32 %v320_v23, %v319_v22 }
  0x73   : > { %311 = vadd.xlane.f32.xlu0 %v310_v24 }
  0x77   : > { %322 = vadd.xlane.f32.xlu0 %v321_v25 }
 0x100   : > { %v312_v26 = vpop.xlane.xlu0 %311 }
 0x101   : > { %314 = vst.msk [vmem:[%s253_s11] sm:$0xf] %vm313_vm3, %v312_v26 }
 0x104   : > { %v323_v27 = vpop.xlane.xlu0 %322 }
 0x105   : > { %324 = vst.msk [vmem:[%s257_s18] sm:$0xf] %vm313_vm3, %v323_v27 }
 0x106 PF: > { %s20_s17 = sadd.s32 1, %s659_s17   ;;  %s866_s12 = smov %s643_s13 }
 0x107   : > { %p17_p9 = scmp.ge.s32.totalorder %s20_s17, 4   ;;  %s867_s13 = smov %s647_s14 }
 0x108   : > { %s868_s14 = smov %s733_s24  ;;  %s869_s15 = smov %s655_s16 }
 0x109   : > { %s870_s16 = smov %s872_s19  ;;  %19 = sbr.rel (!%p17_p9) target bundleno = 6 (0x6), region = 101 }
 0x110   :  { %358 = vsyncpa [#allocation5], 1 }
 0x111   :  { %360 = vsyncpa [#allocation5 + $0x1], 1 }
 0x112   :  { %361 = vsyncpa [#allocation7], 1 }
 0x113   :  { %363 = vsyncpa [#allocation7 + $0x1], 1 }

</bundles_post_ra>
